<compile_context>
chip_gen: v5e
topology: v5e:2x2
jax: 0.10.0
libtpu: 0.0.40
codegen_flags: <defaults>
</compile_context>

<pallas_src>
import jax
import jax.numpy as jnp
from jax import lax
from jax.experimental import pallas as pl
from jax.experimental.pallas import tpu as pltpu

BN_EPS = 1e-5


def _round_up(v, m):
    return (v + m - 1) // m * m


def _pick_row_tile(n_pad):
    """Largest row tile dividing n_pad whose double-buffered bf16 A_hat tile stays
    under ~16 MiB (bigger tiles amortize per-step overhead until VMEM pressure)."""
    budget_rows = max(8, (16 << 20) // (2 * 2 * n_pad))
    if n_pad <= budget_rows:
        return n_pad
    for cand in (1024, 512, 256, 128, 64, 32, 16, 8):
        if cand <= budget_rows and n_pad % cand == 0:
            return cand
    return 8


def _make_kernel(n_true, n_pad, tm):
    inv_n = 1.0 / float(n_true)

    def bn_relu(v, bn_ref):
        # Batch-stat BN folded into one scale/shift; centered two-pass variance
        # (v is fully VMEM-resident, so the second pass is nearly free and avoids
        # the E[x^2]-E[x]^2 cancellation risk).
        mean = jnp.sum(v, axis=0, keepdims=True) * inv_n
        diff = v - mean
        if n_pad > n_true:  # padded (all-zero) rows must not enter the variance
            rows = lax.broadcasted_iota(jnp.int32, v.shape, 0)
            diff = jnp.where(rows < n_true, diff, 0.0)
        var = jnp.sum(diff * diff, axis=0, keepdims=True) * inv_n   # biased var
        s = bn_ref[0:1, :] * lax.rsqrt(var + BN_EPS)                # gamma*rsqrt
        t = bn_ref[1:2, :] - mean * s                               # beta - mean*s
        return jnp.maximum(v * s + t, 0.0)                          # BN+ReLU; dropout=id

    def kernel(a_ref, xw1_ref, w2_ref, bn1_ref, bn2_ref, o_ref, h_ref, hw2_ref):
        p = pl.program_id(0)                      # phase: 0 = layer 1, 1 = layer 2
        t = pl.program_id(1)                      # row-tile index
        last = pl.num_programs(1) - 1
        rows = pl.ds(pl.multiple_of(t * tm, tm), tm)

        # ---- phase 0: H[tile] = A_hat[tile] @ (X @ W1) -----------------------
        @pl.when(p == 0)
        def _():
            h_ref[rows, :] = jnp.dot(a_ref[...], xw1_ref[...],
                                     preferred_element_type=jnp.float32)

        # ---- phase boundary: BN1 + ReLU on resident H, then HW2 = H @ W2 -----
        @pl.when((p == 0) & (t == last))
        def _():
            h_act = bn_relu(h_ref[...], bn1_ref)
            hw2_ref[...] = jnp.dot(h_act.astype(jnp.bfloat16), w2_ref[...],
                                   preferred_element_type=jnp.float32
                                   ).astype(jnp.bfloat16)

        # ---- phase 1: Z[tile] = A_hat[tile] @ HW2 into the resident output ----
        @pl.when(p == 1)
        def _():
            o_ref[rows, :] = jnp.dot(a_ref[...], hw2_ref[...],
                                     preferred_element_type=jnp.float32)

        # ---- finalize: BN2 + ReLU over the resident Z -------------------------
        @pl.when((p == 1) & (t == last))
        def _():
            o_ref[...] = bn_relu(o_ref[...], bn2_ref)

    return kernel


def graph_encoder_forward(x, edge_index, params):
    """x: [N, in_ch] f32; edge_index: [2, E] int32 (row 0 = src, row 1 = dst)."""
    n, in_ch = x.shape
    hid = params["w1"].shape[1]
    lat = params["w2"].shape[1]

    n_pad = _round_up(n, 8)
    hid_pad = _round_up(hid, 128)      # lane-dense activations
    lat_pad = _round_up(lat, 128)      # lane-dense output (unmasked vst)
    tm = _pick_row_tile(n_pad)
    n_tiles = n_pad // tm

    # ---- normalized adjacency (GCN norm, add_self_loops=False), one scatter ----
    src, dst = edge_index[0], edge_index[1]
    deg = jax.ops.segment_sum(jnp.ones(src.shape, jnp.float32), dst, num_segments=n)
    dinv = jnp.where(deg > 0, lax.rsqrt(jnp.maximum(deg, 1e-12)), 0.0)
    w_e = (dinv[dst] * dinv[src]).astype(jnp.bfloat16)          # only E values cast
    a_hat = jnp.zeros((n_pad, n_pad), jnp.bfloat16).at[dst, src].add(w_e)

    # ---- layer-1 feature transform precomputed; in_ch never enters the kernel ----
    w1p = jnp.pad(params["w1"], ((0, 0), (0, hid_pad - hid)))
    xw1 = jnp.pad(jnp.dot(x, w1p), ((0, n_pad - n), (0, 0))).astype(jnp.bfloat16)

    w2p = jnp.pad(params["w2"], ((0, hid_pad - hid), (0, lat_pad - lat))
                  ).astype(jnp.bfloat16)

    # gamma/beta packed lane-aligned: row 0 = gamma (pad with 1), row 1 = beta (pad 0)
    bn1 = jnp.concatenate(
        [jnp.pad(params["g1"], ((0, 0), (0, hid_pad - hid)), constant_values=1.0),
         jnp.pad(params["be1"], ((0, 0), (0, hid_pad - hid)))], axis=0)
    bn2 = jnp.concatenate(
        [jnp.pad(params["g2"], ((0, 0), (0, lat_pad - lat)), constant_values=1.0),
         jnp.pad(params["be2"], ((0, 0), (0, lat_pad - lat)))], axis=0)

    # ---- VMEM budget: double-buffered A_hat tile + resident operands/scratch ----
    est = (2 * tm * n_pad * 2            # A_hat row tile, 2 buffers, bf16
           + 2 * n_pad * hid_pad * 2     # XW1 (allow double buffer)
           + 2 * hid_pad * lat_pad * 2   # W2
           + 2 * 4 * 2 * (hid_pad + lat_pad)   # BN slabs
           + n_pad * hid_pad * 4         # H scratch (f32)
           + n_pad * lat_pad * 2         # HW2 scratch (bf16)
           + n_pad * lat_pad * 4         # resident output block (f32)
           + (4 << 20))                  # Mosaic internal-scratch headroom
    try:
        cap = int(getattr(pltpu.get_tpu_info(), "vmem_capacity_bytes", 64 << 20))
    except Exception:
        cap = 64 << 20                   # conservative: fits v5e/v6e/v7x
    vmem_limit = int(min(max(est, 32 << 20), cap - (8 << 20)))

    flops = 2 * n_pad * n_pad * (hid_pad + lat_pad) + 2 * n_pad * hid_pad * lat_pad
    bytes_accessed = (2 * n_pad * n_pad * 2          # two A_hat streaming passes
                      + n_pad * hid_pad * 2 + hid_pad * lat_pad * 2
                      + n_pad * lat_pad * 4)

    out = pl.pallas_call(
        _make_kernel(n, n_pad, tm),
        out_shape=jax.ShapeDtypeStruct((n_pad, lat_pad), jnp.float32),
        grid_spec=pltpu.PrefetchScalarGridSpec(
            num_scalar_prefetch=0,
            grid=(2, n_tiles),                                        # (phase, row tile)
            in_specs=[
                pl.BlockSpec((tm, n_pad), lambda p, t: (t, 0)),       # A_hat row tile
                pl.BlockSpec((n_pad, hid_pad), lambda p, t: (0, 0)),  # XW1 (resident)
                pl.BlockSpec((hid_pad, lat_pad), lambda p, t: (0, 0)),
                pl.BlockSpec((2, hid_pad), lambda p, t: (0, 0)),
                pl.BlockSpec((2, lat_pad), lambda p, t: (0, 0)),
            ],
            out_specs=pl.BlockSpec((n_pad, lat_pad), lambda p, t: (0, 0)),
            scratch_shapes=[
                pltpu.VMEM((n_pad, hid_pad), jnp.float32),   # H
                pltpu.VMEM((n_pad, lat_pad), jnp.bfloat16),  # H_act @ W2
            ]),
        compiler_params=pltpu.CompilerParams(
            # BN is a global barrier across row tiles -> both axes sequential here.
            dimension_semantics=("arbitrary", "arbitrary"),
            vmem_limit_bytes=vmem_limit),
        cost_estimate=pl.CostEstimate(flops=flops,
                                      transcendentals=2 * (hid_pad + lat_pad),
                                      bytes_accessed=bytes_accessed),
    )(a_hat, xw1, w2p, bn1, bn2)

    return out[:n, :lat]


def init_params(key, in_ch, hid_ch, lat_dim):
    """Parameters matching the nn.Module __init__ shapes (GCNConv bias dropped:
    it is zero-initialized in PyG and cancels under batch-stat BatchNorm)."""
    k1, k2 = jax.random.split(key)

    def glorot(k, shape):
        lim = jnp.sqrt(6.0 / (shape[0] + shape[1]))
        return jax.random.uniform(k, shape, jnp.float32, -lim, lim)

    return {
        "w1": glorot(k1, (in_ch, hid_ch)),
        "w2": glorot(k2, (hid_ch, lat_dim)),
        # BatchNorm1d affine params (PyTorch default: gamma=1, beta=0)
        "g1": jnp.ones((1, hid_ch), jnp.float32),
        "be1": jnp.zeros((1, hid_ch), jnp.float32),
        "g2": jnp.ones((1, lat_dim), jnp.float32),
        "be2": jnp.zeros((1, lat_dim), jnp.float32),
    }


def _reference_forward(x, edge_index, params):
    """Pure-JAX f32 reference with identical semantics (bf16 rounding excepted)."""
    n = x.shape[0]
    src, dst = edge_index[0], edge_index[1]
    deg = jax.ops.segment_sum(jnp.ones(src.shape, jnp.float32), dst, num_segments=n)
    dinv = jnp.where(deg > 0, lax.rsqrt(jnp.maximum(deg, 1e-12)), 0.0)
    a = jnp.zeros((n, n), jnp.float32).at[dst, src].add(dinv[dst] * dinv[src])

    def bn_relu(v, g, b):
        mean = jnp.mean(v, axis=0, keepdims=True)
        var = jnp.mean((v - mean) ** 2, axis=0, keepdims=True)
        return jnp.maximum((v - mean) * lax.rsqrt(var + BN_EPS) * g + b, 0.0)

    h = bn_relu(a @ (x @ params["w1"]), params["g1"], params["be1"])
    z = bn_relu(a @ (h @ params["w2"]), params["g2"], params["be2"])
    return z


if __name__ == "__main__":
    key = jax.random.PRNGKey(0)
    N, in_ch, hid_ch, lat_dim = 16, 4, 32, 16

    kx, kp = jax.random.split(key)
    x = jax.random.normal(kx, (N, in_ch), jnp.float32)

    # deterministic small graph: undirected ring + a couple of chords
    src = jnp.arange(N, dtype=jnp.int32)
    dst = (src + 1) % N
    chords_s = jnp.array([0, 3, 7], dtype=jnp.int32)
    chords_d = jnp.array([8, 11, 15], dtype=jnp.int32)
    e_src = jnp.concatenate([src, dst, chords_s, chords_d])
    e_dst = jnp.concatenate([dst, src, chords_d, chords_s])
    edge_index = jnp.stack([e_src, e_dst])               # [2, E]

    params = init_params(kp, in_ch, hid_ch, lat_dim)

    z = graph_encoder_forward(x, edge_index, params)
    jax.block_until_ready(z)

    assert z.shape == (N, lat_dim)
    assert bool(jnp.all(jnp.isfinite(z)))

    z_ref = _reference_forward(x, edge_index, params)
    err = float(jnp.max(jnp.abs(z - z_ref)))
    assert err < 1e-1, f"max abs error vs reference too large: {err}"

    print("KERNEL_OK")
</pallas_src>

<mosaic_0001>
module attributes {stable_mosaic.version = 11 : i64} {
  func.func @kernel(%arg0: i32, %arg1: i32, %arg2: memref<16x16xbf16, #tpu.memory_space<vmem>>, %arg3: memref<16x128xbf16, #tpu.memory_space<vmem>>, %arg4: memref<128x128xbf16, #tpu.memory_space<vmem>>, %arg5: memref<2x128xf32, #tpu.memory_space<vmem>>, %arg6: memref<2x128xf32, #tpu.memory_space<vmem>>, %arg7: memref<16x128xf32, #tpu.memory_space<vmem>>, %arg8: memref<16x128xf32, #tpu.memory_space<vmem>>, %arg9: memref<16x128xbf16, #tpu.memory_space<vmem>>) attributes {dimension_semantics = [#tpu.dimension_semantics<arbitrary>, #tpu.dimension_semantics<arbitrary>], iteration_bounds = array<i64: 2, 1>, scalar_prefetch = 0 : i64, scratch_operands = 2 : i64, tpu.core_type = #tpu.core_type<tc>, window_params = [{transform_indices = @transform_0, window_bounds = array<i64: 16, 16>}, {pipeline_mode = #tpu.pipeline_mode<synchronous>, transform_indices = @transform_1, window_bounds = array<i64: 16, 128>}, {pipeline_mode = #tpu.pipeline_mode<synchronous>, transform_indices = @transform_2, window_bounds = array<i64: 128, 128>}, {pipeline_mode = #tpu.pipeline_mode<synchronous>, transform_indices = @transform_3, window_bounds = array<i64: 2, 128>}, {pipeline_mode = #tpu.pipeline_mode<synchronous>, transform_indices = @transform_4, window_bounds = array<i64: 2, 128>}, {pipeline_mode = #tpu.pipeline_mode<synchronous>, transform_indices = @transform_5, window_bounds = array<i64: 16, 128>}]} {
    %c16_i32 = arith.constant 16 : i32
    %0 = arith.muli %arg1, %c16_i32 : i32
    %1 = tpu.assume_multiple %0, 16 : i32
    %c0_i32 = arith.constant 0 : i32
    %2 = arith.cmpi eq, %arg0, %c0_i32 : i32
    %3 = arith.extui %2 : i1 to i32
    %c0_i32_0 = arith.constant 0 : i32
    %4 = arith.cmpi ne, %3, %c0_i32_0 : i32
    scf.if %4 {
      %c0 = arith.constant 0 : index
      %c0_8 = arith.constant 0 : index
      %18 = vector.load %arg2[%c0, %c0_8] : memref<16x16xbf16, #tpu.memory_space<vmem>>, vector<16x16xbf16>
      %c0_9 = arith.constant 0 : index
      %c0_10 = arith.constant 0 : index
      %19 = vector.load %arg3[%c0_9, %c0_10] : memref<16x128xbf16, #tpu.memory_space<vmem>>, vector<16x128xbf16>
      %cst = arith.constant dense<0.000000e+00> : vector<16x128xf32>
      %20 = tpu.matmul %18, %19, %cst {dimension_numbers = #tpu.dot_dimension_numbers<[1], [0], [0], [1], [0, 0, 1, 1], [], []>} : vector<16x16xbf16>, vector<16x128xbf16>, vector<16x128xf32> -> vector<16x128xf32>
      %21 = arith.index_cast %1 : i32 to index
      %c0_11 = arith.constant 0 : index
      %22 = vector.load %arg8[%21, %c0_11] : memref<16x128xf32, #tpu.memory_space<vmem>>, vector<16x128xf32>
      tpu.vector_store %arg8[%21, %c0_11], %20 {strides = array<i32>} : memref<16x128xf32, #tpu.memory_space<vmem>>, vector<16x128xf32>,
    } else {
    }
    %c0_i32_1 = arith.constant 0 : i32
    %5 = arith.cmpi eq, %arg0, %c0_i32_1 : i32
    %c0_i32_2 = arith.constant 0 : i32
    %6 = arith.cmpi eq, %arg1, %c0_i32_2 : i32
    %7 = arith.andi %5, %6 : i1
    %8 = arith.extui %7 : i1 to i32
    %c0_i32_3 = arith.constant 0 : i32
    %9 = arith.cmpi ne, %8, %c0_i32_3 : i32
    scf.if %9 {
      %c0 = arith.constant 0 : index
      %c0_8 = arith.constant 0 : index
      %18 = vector.load %arg8[%c0, %c0_8] : memref<16x128xf32, #tpu.memory_space<vmem>>, vector<16x128xf32>
      %cst = arith.constant dense<0.000000e+00> : vector<128xf32>
      %19 = vector.multi_reduction <add>, %18, %cst [0] : vector<16x128xf32> to vector<128xf32>
      %20 = vector.shape_cast %19 : vector<128xf32> to vector<1x128xf32>
      %cst_9 = arith.constant 6.250000e-02 : f32
      %21 = vector.broadcast %cst_9 : f32 to vector<1x128xf32>
      %22 = arith.mulf %20, %21 : vector<1x128xf32>
      %23 = vector.broadcast %22 : vector<1x128xf32> to vector<16x128xf32>
      %24 = arith.subf %18, %23 : vector<16x128xf32>
      %25 = arith.mulf %24, %24 : vector<16x128xf32>
      %cst_10 = arith.constant dense<0.000000e+00> : vector<128xf32>
      %26 = vector.multi_reduction <add>, %25, %cst_10 [0] : vector<16x128xf32> to vector<128xf32>
      %27 = vector.shape_cast %26 : vector<128xf32> to vector<1x128xf32>
      %cst_11 = arith.constant 6.250000e-02 : f32
      %28 = vector.broadcast %cst_11 : f32 to vector<1x128xf32>
      %29 = arith.mulf %27, %28 : vector<1x128xf32>
      %c0_12 = arith.constant 0 : index
      %c0_13 = arith.constant 0 : index
      %30 = vector.load %arg5[%c0_12, %c0_13] : memref<2x128xf32, #tpu.memory_space<vmem>>, vector<1x128xf32>
      %cst_14 = arith.constant 9.99999974E-6 : f32
      %31 = vector.broadcast %cst_14 : f32 to vector<1x128xf32>
      %32 = arith.addf %29, %31 : vector<1x128xf32>
      %33 = math.rsqrt %32 : vector<1x128xf32>
      %34 = arith.mulf %30, %33 : vector<1x128xf32>
      %c1 = arith.constant 1 : index
      %c0_15 = arith.constant 0 : index
      %35 = vector.load %arg5[%c1, %c0_15] : memref<2x128xf32, #tpu.memory_space<vmem>>, vector<1x128xf32>
      %36 = arith.mulf %22, %34 : vector<1x128xf32>
      %37 = arith.subf %35, %36 : vector<1x128xf32>
      %38 = vector.broadcast %34 : vector<1x128xf32> to vector<16x128xf32>
      %39 = arith.mulf %18, %38 : vector<16x128xf32>
      %40 = vector.broadcast %37 : vector<1x128xf32> to vector<16x128xf32>
      %41 = arith.addf %39, %40 : vector<16x128xf32>
      %cst_16 = arith.constant 0.000000e+00 : f32
      %42 = vector.broadcast %cst_16 : f32 to vector<16x128xf32>
      %43 = arith.maximumf %41, %42 : vector<16x128xf32>
      %44 = arith.truncf %43 : vector<16x128xf32> to vector<16x128xbf16>
      %c0_17 = arith.constant 0 : index
      %c0_18 = arith.constant 0 : index
      %45 = vector.load %arg4[%c0_17, %c0_18] : memref<128x128xbf16, #tpu.memory_space<vmem>>, vector<128x128xbf16>
      %cst_19 = arith.constant dense<0.000000e+00> : vector<16x128xf32>
      %46 = tpu.matmul %44, %45, %cst_19 {dimension_numbers = #tpu.dot_dimension_numbers<[1], [0], [0], [1], [0, 0, 1, 1], [], []>} : vector<16x128xbf16>, vector<128x128xbf16>, vector<16x128xf32> -> vector<16x128xf32>
      %47 = arith.truncf %46 : vector<16x128xf32> to vector<16x128xbf16>
      %c0_20 = arith.constant 0 : index
      %c0_21 = arith.constant 0 : index
      %48 = vector.load %arg9[%c0_20, %c0_21] : memref<16x128xbf16, #tpu.memory_space<vmem>>, vector<16x128xbf16>
      tpu.vector_store %arg9[%c0_20, %c0_21], %47 {strides = array<i32>} : memref<16x128xbf16, #tpu.memory_space<vmem>>, vector<16x128xbf16>,
    } else {
    }
    %c1_i32 = arith.constant 1 : i32
    %10 = arith.cmpi eq, %arg0, %c1_i32 : i32
    %11 = arith.extui %10 : i1 to i32
    %c0_i32_4 = arith.constant 0 : i32
    %12 = arith.cmpi ne, %11, %c0_i32_4 : i32
    scf.if %12 {
      %c0 = arith.constant 0 : index
      %c0_8 = arith.constant 0 : index
      %18 = vector.load %arg2[%c0, %c0_8] : memref<16x16xbf16, #tpu.memory_space<vmem>>, vector<16x16xbf16>
      %c0_9 = arith.constant 0 : index
      %c0_10 = arith.constant 0 : index
      %19 = vector.load %arg9[%c0_9, %c0_10] : memref<16x128xbf16, #tpu.memory_space<vmem>>, vector<16x128xbf16>
      %cst = arith.constant dense<0.000000e+00> : vector<16x128xf32>
      %20 = tpu.matmul %18, %19, %cst {dimension_numbers = #tpu.dot_dimension_numbers<[1], [0], [0], [1], [0, 0, 1, 1], [], []>} : vector<16x16xbf16>, vector<16x128xbf16>, vector<16x128xf32> -> vector<16x128xf32>
      %21 = arith.index_cast %1 : i32 to index
      %c0_11 = arith.constant 0 : index
      %22 = vector.load %arg7[%21, %c0_11] : memref<16x128xf32, #tpu.memory_space<vmem>>, vector<16x128xf32>
      tpu.vector_store %arg7[%21, %c0_11], %20 {strides = array<i32>} : memref<16x128xf32, #tpu.memory_space<vmem>>, vector<16x128xf32>,
    } else {
    }
    %c1_i32_5 = arith.constant 1 : i32
    %13 = arith.cmpi eq, %arg0, %c1_i32_5 : i32
    %c0_i32_6 = arith.constant 0 : i32
    %14 = arith.cmpi eq, %arg1, %c0_i32_6 : i32
    %15 = arith.andi %13, %14 : i1
    %16 = arith.extui %15 : i1 to i32
    %c0_i32_7 = arith.constant 0 : i32
    %17 = arith.cmpi ne, %16, %c0_i32_7 : i32
    scf.if %17 {
      %c0 = arith.constant 0 : index
      %c0_8 = arith.constant 0 : index
      %18 = vector.load %arg7[%c0, %c0_8] : memref<16x128xf32, #tpu.memory_space<vmem>>, vector<16x128xf32>
      %cst = arith.constant dense<0.000000e+00> : vector<128xf32>
      %19 = vector.multi_reduction <add>, %18, %cst [0] : vector<16x128xf32> to vector<128xf32>
      %20 = vector.shape_cast %19 : vector<128xf32> to vector<1x128xf32>
      %cst_9 = arith.constant 6.250000e-02 : f32
      %21 = vector.broadcast %cst_9 : f32 to vector<1x128xf32>
      %22 = arith.mulf %20, %21 : vector<1x128xf32>
      %23 = vector.broadcast %22 : vector<1x128xf32> to vector<16x128xf32>
      %24 = arith.subf %18, %23 : vector<16x128xf32>
      %25 = arith.mulf %24, %24 : vector<16x128xf32>
      %cst_10 = arith.constant dense<0.000000e+00> : vector<128xf32>
      %26 = vector.multi_reduction <add>, %25, %cst_10 [0] : vector<16x128xf32> to vector<128xf32>
      %27 = vector.shape_cast %26 : vector<128xf32> to vector<1x128xf32>
      %cst_11 = arith.constant 6.250000e-02 : f32
      %28 = vector.broadcast %cst_11 : f32 to vector<1x128xf32>
      %29 = arith.mulf %27, %28 : vector<1x128xf32>
      %c0_12 = arith.constant 0 : index
      %c0_13 = arith.constant 0 : index
      %30 = vector.load %arg6[%c0_12, %c0_13] : memref<2x128xf32, #tpu.memory_space<vmem>>, vector<1x128xf32>
      %cst_14 = arith.constant 9.99999974E-6 : f32
      %31 = vector.broadcast %cst_14 : f32 to vector<1x128xf32>
      %32 = arith.addf %29, %31 : vector<1x128xf32>
      %33 = math.rsqrt %32 : vector<1x128xf32>
      %34 = arith.mulf %30, %33 : vector<1x128xf32>
      %c1 = arith.constant 1 : index
      %c0_15 = arith.constant 0 : index
      %35 = vector.load %arg6[%c1, %c0_15] : memref<2x128xf32, #tpu.memory_space<vmem>>, vector<1x128xf32>
      %36 = arith.mulf %22, %34 : vector<1x128xf32>
      %37 = arith.subf %35, %36 : vector<1x128xf32>
      %38 = vector.broadcast %34 : vector<1x128xf32> to vector<16x128xf32>
      %39 = arith.mulf %18, %38 : vector<16x128xf32>
      %40 = vector.broadcast %37 : vector<1x128xf32> to vector<16x128xf32>
      %41 = arith.addf %39, %40 : vector<16x128xf32>
      %cst_16 = arith.constant 0.000000e+00 : f32
      %42 = vector.broadcast %cst_16 : f32 to vector<16x128xf32>
      %43 = arith.maximumf %41, %42 : vector<16x128xf32>
      %c0_17 = arith.constant 0 : index
      %c0_18 = arith.constant 0 : index
      %44 = vector.load %arg7[%c0_17, %c0_18] : memref<16x128xf32, #tpu.memory_space<vmem>>, vector<16x128xf32>
      tpu.vector_store %arg7[%c0_17, %c0_18], %43 {strides = array<i32>} : memref<16x128xf32, #tpu.memory_space<vmem>>, vector<16x128xf32>,
    } else {
    }
    return
  }
  func.func @transform_0(%arg0: i32, %arg1: i32) -> (i32, i32) {
    %c0_i32 = arith.constant 0 : i32
    %c0_i32_0 = arith.constant 0 : i32
    return %arg1, %c0_i32 : i32, i32
  }
  func.func @transform_1(%arg0: i32, %arg1: i32) -> (i32, i32) {
    %c0_i32 = arith.constant 0 : i32
    %c0_i32_0 = arith.constant 0 : i32
    %c0_i32_1 = arith.constant 0 : i32
    return %c0_i32, %c0_i32_0 : i32, i32
  }
  func.func @transform_2(%arg0: i32, %arg1: i32) -> (i32, i32) {
    %c0_i32 = arith.constant 0 : i32
    %c0_i32_0 = arith.constant 0 : i32
    %c0_i32_1 = arith.constant 0 : i32
    return %c0_i32, %c0_i32_0 : i32, i32
  }
  func.func @transform_3(%arg0: i32, %arg1: i32) -> (i32, i32) {
    %c0_i32 = arith.constant 0 : i32
    %c0_i32_0 = arith.constant 0 : i32
    %c0_i32_1 = arith.constant 0 : i32
    return %c0_i32, %c0_i32_0 : i32, i32
  }
  func.func @transform_4(%arg0: i32, %arg1: i32) -> (i32, i32) {
    %c0_i32 = arith.constant 0 : i32
    %c0_i32_0 = arith.constant 0 : i32
    %c0_i32_1 = arith.constant 0 : i32
    return %c0_i32, %c0_i32_0 : i32, i32
  }
  func.func @transform_5(%arg0: i32, %arg1: i32) -> (i32, i32) {
    %c0_i32 = arith.constant 0 : i32
    %c0_i32_0 = arith.constant 0 : i32
    %c0_i32_1 = arith.constant 0 : i32
    return %c0_i32, %c0_i32_0 : i32, i32
  }
}

</mosaic_0001>

<bundles_post_ra>
// kernel: tpu_custom_call.1
= control target key start
LH: loop header
LB: loop body
LE: loop exit
PB: predicated region body
PF: predicated region fallthrough
CT: control target
= control target key end

     0   :  { %10 = vsyncpa [#allocation5], 0  ;;  %s1131_s0 = inlined_call_operand.hbm [shape: bf16[16,16], index: 0, kind: input, shape index: {}]   ;;  %s1132_s1 = inlined_call_operand.hbm [shape: bf16[16,128], index: 1, kind: input, shape index: {}]   ;;  %s1133_s2 = inlined_call_operand.hbm [shape: bf16[128,128], index: 2, kind: input, shape index: {}]   ;;  %s1134_s3 = inlined_call_operand.vmem [shape: f32[2,128], index: 3, kind: input, shape index: {}]   ;;  %s1135_s4 = inlined_call_operand.hbm [shape: f32[2,128], index: 4, kind: input, shape index: {}]   ;;  %s1136_s5 = inlined_call_operand.hbm [shape: f32[16,128], index: 5, kind: output, shape index: {}]  }
   0x1   :  { %11 = vsyncpa [#allocation8], 0 }
   0x2   :  { %12 = vsyncpa [#allocation11], 0 }
   0x3   :  { %13 = vsyncpa [#allocation6], 0  ;;  %s1034_s18 = smov 0   ;;  %s1036_s19 = smov 0  }
   0x4   :  { %s1038_s20 = smov 0  }
   0x5 LB: > { %s639_s21 = sadd.s32 4294967295, %s993_s20   ;;  %p640_p0 = scmp.ge.s32.totalorder %s993_s20, 1  ;;  %s993_s20 = sphi %s1038_s20, %s19_s20   ;;  %s989_s19 = sphi %s1036_s19, %s1141_s19   ;;  %s985_s18 = sphi %s1034_s18, %s1140_s18  }
   0x6   : > { %p167_p1 = scmp.lt.s32.totalorder %s993_s20, 3  ;;  %p1054_p2 = scmp.eq.s32.totalorder %s639_s21, 0 }
   0x7   : > { %s195_s25 = sshll.u32 %s1132_s1, 4  ;;  %s995_s27 = smov [#allocation7]   ;;  %s196_s25 = int_to_ptr.hbm [resolvable:$true] %s195_s25 }
   0x8   : > { %p1061_p3 = pnand %p640_p0, %p167_p1  ;;  %s197_s28 = sshll.u32 %s995_s27, 4  ;;  %s198_s28 = int_to_ptr.vmem [resolvable:$true] %s197_s28 }
   0x9   : > { %s31_s30 = sadd.s32 1, %s989_s19  ;;  %s996_s6 = smov 64  }
   0xa   : > { %p747_p4 = pneg %p1061_p3  ;;  %p33_p6 = scmp.ge.s32.totalorder %s31_s30, 2 }
   0xb   : > { %s997_s7 = smov 4   ;;  %s181_s10 = sshll.u32 %s1131_s0, 4  ;;  %s182_s10 = int_to_ptr.hbm [resolvable:$true] %s181_s10 }
   0xc   : > { %p1069_p5 = pnand %p1054_p2, %p747_p4  ;;  %s1143_s30 = smov (%p33_p6, %s31_s30), 0 }
   0xd   : > { %s998_s11 = smov [#allocation4]   ;;  %s209_s15 = sshll.u32 %s1133_s2, 4  ;;  %s210_s15 = int_to_ptr.hbm [resolvable:$true] %s209_s15 }
   0xe   : > { %753 = dma.hbm_to_vmem [thread:$0]  (!%p1069_p5), %s196_s25, 128, %s198_s28, [#allocation8], %s996_s6, %s996_s6, %s997_s7  }
   0xf   : > { %s183_s12 = sshll.u32 %s998_s11, 4  ;;  %s999_s16 = smov [#allocation9]   ;;  %s184_s12 = int_to_ptr.vmem [resolvable:$true] %s183_s12 }
  0x10   : > { %750 = dma.hbm_to_vmem [thread:$0]  (!%p1069_p5), %s182_s10, 128, %s184_s12, [#allocation5], %s996_s6, %s996_s6, %s997_s7  }
  0x11   : > { %s211_s17 = sshll.u32 %s999_s16, 4  ;;  %s227_s25 = sshll.u32 %s1135_s4, 4  ;;  %s212_s17 = int_to_ptr.vmem [resolvable:$true] %s211_s17  ;;  %s228_s25 = int_to_ptr.hbm [resolvable:$true] %s227_s25 }
  0x12   : > { %756 = dma.hbm_to_vmem [thread:$0]  (!%p1069_p5), %s210_s15, 1024, %s212_s17, [#allocation8], %s996_s6, %s996_s6, %s997_s7  }
  0x13   : > { %s1000_s27 = smov [#allocation10]   ;;  %242 = sbr.rel (%p1061_p3) target bundleno = 618 (0x26a), region = 40 }
  0x14   : > { %s229_s28 = sshll.u32 %s1000_s27, 4  ;;  %s230_s28 = int_to_ptr.vmem [resolvable:$true] %s229_s28 }
  0x15   : > { %759 = dma.hbm_to_vmem [thread:$0]  (!%p1069_p5), %s228_s25, 32, %s230_s28, [#allocation11]  }
  0x18   : > { %968 = dma.done.wait (%p1054_p2), [#allocation5], 128  }
  0x19   : > { %970 = vsyncadd (%p1054_p2), [#allocation5], 4294967168 }
  0x1a   : > { %972 = dma.done.wait (%p1054_p2), [#allocation8], 1152  }
  0x1b   : > { %974 = vsyncadd (%p1054_p2), [#allocation8], 4294966144 }
  0x1c   : > { %976 = dma.done.wait (%p1054_p2), [#allocation11], 32  }
  0x1d   : > { %978 = vsyncadd (%p1054_p2), [#allocation11], 4294967264  ;;  %p279_p7 = scmp.eq.s32.totalorder %s985_s18, 0  ;;  %p650_p8 = scmp.ne.s32.totalorder %s985_s18, 0 }
  0x1f   : > { %282 = sbr.rel (%p650_p8) target bundleno = 175 (0xaf), region = 60 }
  0x24   : > { %v709_v0 = vld [vmem:[#allocation7] sm:$0xff]  ;;  %v708_v1 = vld [vmem:[#allocation4] sm:$0xff]  ;;  %vm298_vm0 = vcmask 130048  }
  0x25   : > { %309 = vmatpush.bf16.msra.mxu0 %v709_v0 }
  0x28   : > { %659 = vmatmul.msk.bf16.vlgmr.msra.gmra.mxu0 %vm298_vm0, %v708_v1 }
  0xa5   : > { %v311_v2 = vpop.f32.mrf.mxu0 }
  0xa6   : > { %317 = vst [vmem:[#allocation2] sm:$0xff] %v311_v2 }
  0xad   : > { %v313_v3 = vpop.f32.mrf.mxu0 }
  0xae   : > { %318 = vst [vmem:[#allocation2 + $0x8] sm:$0xff] %v313_v3 }
  0xaf PF: > { %323 = sbr.rel (!%p279_p7) target bundleno = 389 (0x185), region = 64  ;;  %v718_v4 = vld [vmem:[#allocation9 + $0x38] sm:$0xff] (%p279_p7)  ;;  %v717_v5 = vld [vmem:[#allocation9 + $0x30] sm:$0xff] (%p279_p7)  ;;  %v716_v9 = vld [vmem:[#allocation9 + $0x28] sm:$0xff] (%p279_p7) }
  0xb0   : > { %435 = vmatpush.bf16.msra.mxu0 (%p279_p7), %v718_v4  ;;  %v324_v6 = vld [vmem:[#allocation2] sm:$0xff] (%p279_p7)  ;;  %v715_v12 = vld [vmem:[#allocation9 + $0x20] sm:$0xff] (%p279_p7)  ;;  %v713_v18 = vld [vmem:[#allocation9 + $0x10] sm:$0xff] (%p279_p7) }
  0xb1   : > { %v714_v15 = vld [vmem:[#allocation9 + $0x18] sm:$0xff] (%p279_p7)  ;;  %v712_v22 = vld [vmem:[#allocation9 + $0x8] sm:$0xff] (%p279_p7)  ;;  %v711_v26 = vld [vmem:[#allocation9] sm:$0xff] (%p279_p7) }
  0xb2   : > { %v346_v40 = vld [vmem:[%s1134_s3] sm:$0x1] (%p279_p7)  ;;  %v359_v44 = vld [vmem:[%s1134_s3 + $0x1] sm:$0x1] (%p279_p7) }
  0xb4   : > { %436 = vmatpush.bf16.msra.mxu0 %v717_v5 }
  0xb5   : > { %v325_v7 = vld [vmem:[#allocation2 + $0x8] sm:$0xff] }
  0xb6   : > { %v326_v8 = vadd.f32 %v325_v7, %v324_v6 }
  0xb8   : > { %v327_v10 = vrot.slane %v326_v8, 4  ;;  %437 = vmatpush.bf16.msra.mxu0 %v716_v9 }
  0xba   : > { %v328_v11 = vadd.f32 %v327_v10, %v326_v8 }
  0xbc   : > { %v329_v13 = vrot.slane %v328_v11, 2  ;;  %438 = vmatpush.bf16.msra.mxu0 %v715_v12 }
  0xbe   : > { %v330_v14 = vadd.f32 %v329_v13, %v328_v11 }
  0xc0   : > { %v331_v16 = vrot.slane %v330_v14, 1  ;;  %439 = vmatpush.bf16.msra.mxu0 %v714_v15 }
  0xc2   : > { %v332_v17 = vadd.f32 %v331_v16, %v330_v14 }
  0xc4   : > { %v333_v19 = vmul.f32 0.0625, %v332_v17  ;;  %440 = vmatpush.bf16.msra.mxu0 %v713_v18 }
  0xc6   : > { %v334_v20 = vsub.f32 %v324_v6, %v333_v19  ;;  %v335_v21 = vsub.f32 %v325_v7, %v333_v19 }
  0xc8   : > { %v336_v23 = vmul.f32 %v334_v20, %v334_v20  ;;  %v337_v24 = vmul.f32 %v335_v21, %v335_v21  ;;  %441 = vmatpush.bf16.msra.mxu0 %v712_v22 }
  0xca   : > { %v338_v25 = vadd.f32 %v337_v24, %v336_v23 }
  0xcc   : > { %v339_v27 = vrot.slane %v338_v25, 4  ;;  %442 = vmatpush.bf16.msra.mxu0 %v711_v26 }
  0xce   : > { %v340_v28 = vadd.f32 %v339_v27, %v338_v25 }
  0xd0   : > { %v341_v29 = vrot.slane %v340_v28, 2 }
  0xd2   : > { %v342_v30 = vadd.f32 %v341_v29, %v340_v28 }
  0xd4   : > { %v343_v31 = vrot.slane %v342_v30, 1 }
  0xd6   : > { %v344_v32 = vadd.f32 %v343_v31, %v342_v30 }
  0xd8   : > { %v345_v33 = vmul.f32 0.0625, %v344_v32 }
  0xda   : > { %v347_v34 = vadd.f32 1e-05, %v345_v33 }
  0xdc   : > { %803 = vrsqrt.f32 %v347_v34  ;;  %vm354_vm1 = vweird.f32 %v347_v34 }
  0xe2   : > { %v804_v35 = vpop.eup %803 }
  0xe3   : > { %v349_v36 = vmul.f32 %v804_v35, %v347_v34  ;;  %vm355_vm2 = vweird.f32 %v804_v35 }
  0xe4   : > { %vm356_vm3 = vmor %vm354_vm1, %vm355_vm2 }
  0xe5   : > { %v350_v37 = vmul.f32 %v804_v35, %v349_v36 }
  0xe7   : > { %v351_v38 = vmul.f32 0.5, %v350_v37 }
  0xe9   : > { %v352_v39 = vsub.f32 1.5, %v351_v38 }
  0xeb   : > { %v353_v41 = vmul.f32 %v804_v35, %v352_v39 }
  0xed   : > { %v357_v42 = vsel %vm356_vm3, %v804_v35, %v353_v41 }
  0xee   : > { %v358_v43 = vmul.f32 %v357_v42, %v346_v40 }
  0xf0   : > { %v360_v45 = vmul.f32 %v358_v43, %v333_v19  ;;  %v362_v46 = vperm.slane %v358_v43, 0 }
  0xf2   : > { %v361_v47 = vsub.f32 %v359_v44, %v360_v45  ;;  %v363_v48 = vmul.f32 %v362_v46, %v324_v6  ;;  %v364_v49 = vmul.f32 %v362_v46, %v325_v7 }
  0xf4   : > { %v365_v50 = vperm.slane %v361_v47, 0 }
  0xf6   : > { %v366_v51 = vadd.f32 %v365_v50, %v363_v48  ;;  %v367_v52 = vadd.f32 %v365_v50, %v364_v49 }
  0xf8   : > { %v368_v53 = vmax.f32 %v366_v51, 0.0  ;;  %v369_v54 = vmax.f32 %v367_v52, 0.0 }
  0xfa   : > { %v370_v55 = vpack.c.bf16 %v369_v54, %v368_v53 }
  0xfc   : > { %443 = vmatmul.bf16.vlgmr.msra.gmra.mxu0 %v370_v55 }
 0x179   : > { %v444_v56 = vpop.f32.mrf.mxu0 }
 0x181   : > { %v446_v57 = vpop.f32.mrf.mxu0 }
 0x182   : > { %v725_v58 = vpack.c.bf16 %v446_v57, %v444_v56 }
 0x184   : > { %726 = vst [vmem:[#allocation3] sm:$0xff] %v725_v58  }
 0x185 PF: > { %p453_p9 = scmp.eq.s32.totalorder %s985_s18, 1  ;;  %p693_p10 = scmp.ne.s32.totalorder %s985_s18, 1 }
 0x187   : > { %456 = sbr.rel (%p693_p10) target bundleno = 535 (0x217), region = 68 }
 0x18c   : > { %v720_v59 = vld [vmem:[#allocation3] sm:$0xff]  ;;  %v719_v60 = vld [vmem:[#allocation4] sm:$0xff]  ;;  %vm472_vm4 = vcmask 130048  }
 0x18d   : > { %483 = vmatpush.bf16.msra.mxu0 %v720_v59 }
 0x190   : > { %702 = vmatmul.msk.bf16.vlgmr.msra.gmra.mxu0 %vm472_vm4, %v719_v60 }
 0x20d   : > { %v485_v61 = vpop.f32.mrf.mxu0 }
 0x20e   : > { %491 = vst [vmem:[#allocation12] sm:$0xff] %v485_v61 }
 0x215   : > { %v487_v62 = vpop.f32.mrf.mxu0 }
 0x216   : > { %492 = vst [vmem:[#allocation12 + $0x8] sm:$0xff] %v487_v62 }
 0x217 PF: > { %496 = sbr.rel (!%p453_p9) target bundleno = 612 (0x264), region = 72  ;;  %v497_v63 = vld [vmem:[#allocation12] sm:$0xff] (%p453_p9)  ;;  %v519_v27 = vld [vmem:[#allocation10] sm:$0x1] (%p453_p9)  ;;  %v532_v31 = vld [vmem:[#allocation10 + $0x1] sm:$0x1] (%p453_p9) }
 0x21d   : > { %v498_v0 = vld [vmem:[#allocation12 + $0x8] sm:$0xff] }
 0x21e   : > { %v499_v1 = vadd.f32 %v498_v0, %v497_v63 }
 0x220   : > { %v500_v2 = vrot.slane %v499_v1, 4 }
 0x222   : > { %v501_v3 = vadd.f32 %v500_v2, %v499_v1 }
 0x224   : > { %v502_v4 = vrot.slane %v501_v3, 2 }
 0x226   : > { %v503_v5 = vadd.f32 %v502_v4, %v501_v3 }
 0x228   : > { %v504_v6 = vrot.slane %v503_v5, 1 }
 0x22a   : > { %v505_v7 = vadd.f32 %v504_v6, %v503_v5 }
 0x22c   : > { %v506_v8 = vmul.f32 0.0625, %v505_v7 }
 0x22e   : > { %v507_v9 = vsub.f32 %v497_v63, %v506_v8  ;;  %v508_v10 = vsub.f32 %v498_v0, %v506_v8 }
 0x230   : > { %v509_v11 = vmul.f32 %v507_v9, %v507_v9  ;;  %v510_v12 = vmul.f32 %v508_v10, %v508_v10 }
 0x232   : > { %v511_v13 = vadd.f32 %v510_v12, %v509_v11 }
 0x234   : > { %v512_v14 = vrot.slane %v511_v13, 4 }
 0x236   : > { %v513_v15 = vadd.f32 %v512_v14, %v511_v13 }
 0x238   : > { %v514_v16 = vrot.slane %v513_v15, 2 }
 0x23a   : > { %v515_v17 = vadd.f32 %v514_v16, %v513_v15 }
 0x23c   : > { %v516_v18 = vrot.slane %v515_v17, 1 }
 0x23e   : > { %v517_v19 = vadd.f32 %v516_v18, %v515_v17 }
 0x240   : > { %v518_v20 = vmul.f32 0.0625, %v517_v19 }
 0x242   : > { %v520_v21 = vadd.f32 1e-05, %v518_v20 }
 0x244   : > { %805 = vrsqrt.f32 %v520_v21  ;;  %vm527_vm5 = vweird.f32 %v520_v21 }
 0x24a   : > { %v806_v22 = vpop.eup %805 }
 0x24b   : > { %v522_v23 = vmul.f32 %v806_v22, %v520_v21  ;;  %vm528_vm6 = vweird.f32 %v806_v22 }
 0x24c   : > { %vm529_vm7 = vmor %vm527_vm5, %vm528_vm6 }
 0x24d   : > { %v523_v24 = vmul.f32 %v806_v22, %v522_v23 }
 0x24f   : > { %v524_v25 = vmul.f32 0.5, %v523_v24 }
 0x251   : > { %v525_v26 = vsub.f32 1.5, %v524_v25 }
 0x253   : > { %v526_v28 = vmul.f32 %v806_v22, %v525_v26 }
 0x255   : > { %v530_v29 = vsel %vm529_vm7, %v806_v22, %v526_v28 }
 0x256   : > { %v531_v30 = vmul.f32 %v530_v29, %v519_v27 }
 0x258   : > { %v533_v32 = vmul.f32 %v531_v30, %v506_v8  ;;  %v535_v33 = vperm.slane %v531_v30, 0 }
 0x25a   : > { %v534_v34 = vsub.f32 %v532_v31, %v533_v32  ;;  %v536_v35 = vmul.f32 %v535_v33, %v497_v63  ;;  %v537_v36 = vmul.f32 %v535_v33, %v498_v0 }
 0x25c   : > { %v538_v37 = vperm.slane %v534_v34, 0 }
 0x25e   : > { %v539_v38 = vadd.f32 %v538_v37, %v536_v35  ;;  %v540_v39 = vadd.f32 %v538_v37, %v537_v36 }
 0x260   : > { %v541_v40 = vmax.f32 %v539_v38, 0.0  ;;  %v542_v41 = vmax.f32 %v540_v39, 0.0 }
 0x262   : > { %543 = vst [vmem:[#allocation12] sm:$0xff] %v541_v40 }
 0x263   : > { %544 = vst [vmem:[#allocation12 + $0x8] sm:$0xff] %v542_v41 }
 0x264 PF: > { %p768_p11 = scmp.eq.s32.totalorder %s639_s21, 1  ;;  %s552_s8 = sshll.u32 %s1136_s5, 4  ;;  %s553_s8 = int_to_ptr.hbm [resolvable:$true] %s552_s8 }
 0x265   : > { %s1001_s9 = smov [#allocation12]   ;;  %s1002_s11 = smov 128  }
 0x266   : > { %s550_s10 = sshll.u32 %s1001_s9, 4  ;;  %s1003_s12 = smov 8   ;;  %s551_s10 = int_to_ptr.vmem [resolvable:$true] %s550_s10 }
 0x267   : > { %744 = dma.vmem_to_hbm [thread:$0]  (%p768_p11), %s551_s10, 256, %s553_s8, [#allocation6], %s1002_s11, %s1002_s11, %s1003_s12  }
 0x268   : > { %980 = dma.done.wait (%p768_p11), [#allocation6], 256  }
 0x269   : > { %982 = vsyncadd (%p768_p11), [#allocation6], 4294967040 }
 0x26a PF: > { %s19_s20 = sadd.s32 1, %s993_s20   ;;  %s1140_s18 = smov %s989_s19 }
 0x26b   : > { %p16_p12 = scmp.ge.s32.totalorder %s19_s20, 4   ;;  %s1141_s19 = smov %s1143_s30 }
 0x26d   :  { %18 = sbr.rel (!%p16_p12) target bundleno = 5 (0x5), region = 100 }
 0x272   :  { %569 = vsyncpa [#allocation5], 1 }
 0x273   :  { %571 = vsyncpa [#allocation5 + $0x1], 1 }
 0x274   :  { %572 = vsyncpa [#allocation8], 1 }
 0x275   :  { %573 = vsyncpa [#allocation11], 1 }
 0x276   :  { %574 = vsyncpa [#allocation6], 1 }
 0x277   :  { %576 = vsyncpa [#allocation6 + $0x1], 1 }

</bundles_post_ra>
